<compile_context>
chip_gen: v7x
topology: tpu7x:2x2x1
jax: 0.10.0
libtpu: 0.0.40
codegen_flags: <defaults>
</compile_context>

<pallas_src>
import functools
import math

import numpy as np
import jax
import jax.numpy as jnp
from jax.experimental import pallas as pl
from jax.experimental.pallas import tpu as pltpu

_MIB = 1 << 20


def _round_up(x, m):
    return (x + m - 1) // m * m


def _mosaic_params(dims, est_bytes):
    """CompilerParams with an explicit, v7x-safe VMEM budget."""
    limit = int(min(max(2 * est_bytes + 2 * _MIB, 16 * _MIB), 56 * _MIB))
    return pltpu.CompilerParams(dimension_semantics=dims,
                                vmem_limit_bytes=limit)


def _pick_tile_m(M, bytes_per_row, budget=24 * _MIB):
    """Largest M tile dividing M whose double-buffered rows fit the budget."""
    divisors = [t for t in (1024, 512, 256, 128, 64, 32, 16, 8) if M % t == 0]
    for t in divisors:
        if 2 * t * bytes_per_row <= budget:
            return t
    return divisors[-1] if divisors else M


# ----------------------------------------------------------------------------
# pltpu.roll (skew) calibration probe.
# We need, per row i, a circular roll by (t0 + slope*i) mod n along the lane
# axis.  The probe finds (shift, stride) arguments realising that under the
# installed pltpu.roll convention, or returns None (-> masked-select fallback).
# ----------------------------------------------------------------------------
_ROLL_CACHE = {}


def _roll_probe_kernel(x_ref, o_ref, *, shift, stride):
    o_ref[...] = pltpu.roll(x_ref[...], shift, 1, stride=stride, stride_axis=0)


def _find_roll_params(n, n_rows, t0, slope):
    key = (n, n_rows, t0, slope)
    if key in _ROLL_CACHE:
        return _ROLL_CACHE[key]
    xn = (np.arange(n, dtype=np.float32)[None, :]
          + 100.0 * np.arange(n_rows, dtype=np.float32)[:, None])
    want = np.stack([np.roll(xn[i], (t0 + slope * i) % n)
                     for i in range(n_rows)])
    cands = []
    for sh, st in ((t0 % n, slope % n), (t0 % n, slope),
                   ((-t0) % n, (-slope) % n), ((-t0) % n, -slope)):
        if (int(sh), int(st)) not in cands:
            cands.append((int(sh), int(st)))
    result = None
    x_dev = jnp.asarray(xn)
    for sh, st in cands:
        try:
            fn = pl.pallas_call(
                functools.partial(_roll_probe_kernel, shift=sh, stride=st),
                out_shape=jax.ShapeDtypeStruct((n_rows, n), jnp.float32))
            out = np.asarray(jax.block_until_ready(fn(x_dev)))
            if np.array_equal(out, want):
                result = (sh, st)
                break
        except Exception:
            continue
    _ROLL_CACHE[key] = result
    return result


# ----------------------------------------------------------------------------
# Kernel 1: fused QKV projection.  B*L folded into the matmul M dimension,
# weights pre-cast and VMEM-resident, outputs masked + emitted in compute dtype.
# ----------------------------------------------------------------------------
def _fused_qkv_kernel(x_ref, w_ref, b_ref, qm_ref, km_ref,
                      q_ref, k_ref, v_ref, *, d_model, compute_dtype):
    x = x_ref[...].astype(compute_dtype)
    y = jnp.dot(x, w_ref[...], preferred_element_type=jnp.float32) + b_ref[...]
    qm = qm_ref[...] > 0.5          # (TM, 1), 1.0 == masked
    km = km_ref[...] > 0.5
    d = d_model
    q_ref[...] = jnp.where(qm, 0.0, y[:, 0 * d:1 * d]).astype(q_ref.dtype)
    k_ref[...] = jnp.where(km, 0.0, y[:, 1 * d:2 * d]).astype(k_ref.dtype)
    v_ref[...] = jnp.where(km, 0.0, y[:, 2 * d:3 * d]).astype(v_ref.dtype)


def fused_qkv_proj(x2d, wqkv, bqkv, qmask2d, kvmask2d, *, d_model,
                   compute_dtype):
    M, Din = x2d.shape
    abytes = jnp.dtype(compute_dtype).itemsize
    row_bytes = Din * x2d.dtype.itemsize + 3 * d_model * abytes
    TM = _pick_tile_m(M, row_bytes)
    est = (2 * TM * row_bytes + 2 * wqkv.size * wqkv.dtype.itemsize
           + 3 * d_model * 4 + 4 * TM + TM * 3 * d_model * 4)
    kern = functools.partial(_fused_qkv_kernel, d_model=d_model,
                             compute_dtype=compute_dtype)
    return pl.pallas_call(
        kern,
        out_shape=tuple(jax.ShapeDtypeStruct((M, d_model), compute_dtype)
                        for _ in range(3)),
        grid=(M // TM,),
        in_specs=[
            pl.BlockSpec((TM, Din), lambda i: (i, 0)),
            pl.BlockSpec((Din, 3 * d_model), lambda i: (0, 0)),
            pl.BlockSpec((1, 3 * d_model), lambda i: (0, 0)),
            pl.BlockSpec((TM, 1), lambda i: (i, 0)),
            pl.BlockSpec((TM, 1), lambda i: (i, 0)),
        ],
        out_specs=tuple(pl.BlockSpec((TM, d_model), lambda i: (i, 0))
                        for _ in range(3)),
        compiler_params=_mosaic_params(("parallel",), est),
    )(x2d, wqkv, bqkv, qmask2d, kvmask2d)


# ----------------------------------------------------------------------------
# Kernel 2: generic masked linear (output projection / cross-attn fallback).
# ----------------------------------------------------------------------------
def _masked_linear_kernel(x_ref, w_ref, b_ref, m_ref, o_ref, *, compute_dtype):
    x = x_ref[...].astype(compute_dtype)
    y = jnp.dot(x, w_ref[...], preferred_element_type=jnp.float32) + b_ref[...]
    o_ref[...] = jnp.where(m_ref[...] > 0.5, 0.0, y).astype(o_ref.dtype)


def masked_linear(x2d, w, b, mask2d, *, compute_dtype, out_dtype=jnp.float32):
    M, Din = x2d.shape
    Dout = w.shape[1]
    row_bytes = (Din * x2d.dtype.itemsize
                 + Dout * jnp.dtype(out_dtype).itemsize)
    TM = _pick_tile_m(M, row_bytes)
    est = (2 * TM * row_bytes + 2 * w.size * w.dtype.itemsize
           + Dout * 4 + 4 * TM + TM * Dout * 4)
    kern = functools.partial(_masked_linear_kernel, compute_dtype=compute_dtype)
    return pl.pallas_call(
        kern,
        out_shape=jax.ShapeDtypeStruct((M, Dout), out_dtype),
        grid=(M // TM,),
        in_specs=[
            pl.BlockSpec((TM, Din), lambda i: (i, 0)),
            pl.BlockSpec((Din, Dout), lambda i: (0, 0)),
            pl.BlockSpec((1, Dout), lambda i: (0, 0)),
            pl.BlockSpec((TM, 1), lambda i: (i, 0)),
        ],
        out_specs=pl.BlockSpec((TM, Dout), lambda i: (i, 0)),
        compiler_params=_mosaic_params(("parallel",), est),
    )(x2d, w, b, mask2d)


# ----------------------------------------------------------------------------
# Kernel 3: relative-position attention, one batch element per grid step.
# ----------------------------------------------------------------------------
def _rel_attn_kernel(q_ref, k_ref, v_ref, wk_ref, wv_ref, m_ref, *out_refs,
                     num_head, dim_per_head, kclip, time_step, skew, unskew,
                     compute_dtype):
    x_ref = out_refs[0]
    attn_ref = out_refs[1] if len(out_refs) > 1 else None

    Lq = q_ref.shape[1]
    Lk = k_ref.shape[1]
    dh = dim_per_head
    R = 2 * kclip + 1
    use_roll = skew is not None
    inv_sqrt_dh = 1.0 / math.sqrt(dh)
    approx = compute_dtype != jnp.float32

    q = q_ref[0]                                   # (Lq, H*dh)
    k = k_ref[0]                                   # (Lk, H*dh)
    v = v_ref[0]
    wk_tab = wk_ref[...]                           # (C_pad, dh) or (R, dh)
    wv_tab = wv_ref[...]

    # Additive key-mask bias.  Finite -1e30 (not -inf): exp() still underflows
    # to exactly 0 for masked keys; fully-masked rows give a uniform row
    # instead of the reference's NaN (documented behavioural difference).
    bias = m_ref[0] * jnp.float32(-1e30)           # (1, Lk)

    if use_roll:
        C_pad = wk_tab.shape[0]
        zpad = (jnp.zeros((Lq, C_pad - Lk), jnp.float32)
                if C_pad > Lk else None)           # hoisted out of the loop
    else:
        # Fallback: hoist the head-invariant one-hot masks out of the loop so
        # the integer compares happen once per batch element, not R*H times.
        qpos = jax.lax.broadcasted_iota(jnp.int32, (Lq, Lk), 0) + time_step
        vpos = jax.lax.broadcasted_iota(jnp.int32, (Lq, Lk), 1)
        r_idx = jnp.clip(vpos - qpos, -kclip, kclip) + kclip
        onehot = [r_idx == r for r in range(R)]

    ctx = []
    for h in range(num_head):
        sl = slice(h * dh, (h + 1) * dh)
        qh = q[:, sl].astype(compute_dtype)
        kh = k[:, sl].astype(compute_dtype)
        vh = v[:, sl].astype(compute_dtype)

        # Content score q k^T (contract dh, no explicit transpose).
        scores = jax.lax.dot_general(
            qh, kh, (((1,), (1,)), ((), ())),
            preferred_element_type=jnp.float32)                  # (Lq, Lk)

        # Relative-key score against the extended table (width >= 128, so the
        # MXU is no longer underfilled the way the old (Lq,dh)x(dh,R) op was).
        p = jax.lax.dot_general(
            qh, wk_tab, (((1,), (1,)), ((), ())),
            preferred_element_type=jnp.float32)   # (Lq, C_pad) or (Lq, R)

        if use_roll:
            # skew: rel[q, v] = p[q, v - q + Lq - 1]  (one XLU roll, no VPU
            # select passes).
            rel = pltpu.roll(p, skew[0], 1, stride=skew[1],
                             stride_axis=0)[:, :Lk]
        else:
            rel = jnp.zeros((Lq, Lk), jnp.float32)
            for r in range(R):
                rel = rel + jnp.where(onehot[r], p[:, r:r + 1], 0.0)

        scores = (scores + rel) * inv_sqrt_dh + bias
        mmax = jnp.max(scores, axis=-1, keepdims=True)
        e = jnp.exp(scores - mmax)
        denom = jnp.sum(e, axis=-1, keepdims=True)
        attn = e * pl.reciprocal(denom, approx=approx)   # EUP slot

        if attn_ref is not None:
            attn_ref[0, h] = attn.astype(attn_ref.dtype)

        xh = jnp.dot(attn.astype(compute_dtype), vh,
                     preferred_element_type=jnp.float32)         # (Lq, dh)

        if use_roll:
            # inverse skew: a_ext[q, c] = attn[q, c - Lq + 1 + q] (0 outside),
            # then one MXU matmul against the extended value table.
            a_pad = attn if zpad is None else jnp.concatenate([attn, zpad],
                                                              axis=1)
            a_ext = pltpu.roll(a_pad, unskew[0], 1, stride=unskew[1],
                               stride_axis=0)
            xh = xh + jnp.dot(a_ext.astype(compute_dtype), wv_tab,
                              preferred_element_type=jnp.float32)
        else:
            acols = [jnp.sum(jnp.where(onehot[r], attn, 0.0), axis=-1,
                             keepdims=True) for r in range(R)]
            a_bucket = jnp.concatenate(acols, axis=-1).astype(compute_dtype)
            xh = xh + jnp.dot(a_bucket, wv_tab,
                              preferred_element_type=jnp.float32)
        ctx.append(xh)

    # Single lane-dense (Lq, H*dh) store instead of H masked partial stores.
    x_ref[0] = jnp.concatenate(ctx, axis=-1).astype(x_ref.dtype)


def rel_attention(q, k, v, wk_emb, wv_emb, kv_mask_b, *, num_head, kclip,
                  time_step=0, compute_dtype=jnp.bfloat16, return_attn=True):
    B, Lq, D = q.shape
    Lk = k.shape[1]
    dh = D // num_head
    R = 2 * kclip + 1
    C = Lq + Lk - 1
    C_pad = max(_round_up(C, 128), 128)

    nrows = int(min(max(Lq, 8), 256))
    skew = _find_roll_params(C_pad, nrows, (1 - Lq) % C_pad, 1)
    unskew = _find_roll_params(C_pad, nrows, (Lq - 1) % C_pad, -1)
    use_roll = (skew is not None) and (unskew is not None)

    if use_roll:
        # Extended relative-coordinate tables: row c covers d = c-(Lq-1)-ts.
        c = jnp.arange(C_pad)
        ridx = jnp.clip(c - (Lq - 1) - time_step, -kclip, kclip) + kclip
        valid = (c < C)[:, None]
        wk_tab = jnp.where(valid, wk_emb[ridx], 0.0).astype(compute_dtype)
        wv_tab = jnp.where(valid, wv_emb[ridx], 0.0).astype(compute_dtype)
        Tdim = C_pad
    else:
        skew = unskew = None
        wk_tab = wk_emb.astype(compute_dtype)
        wv_tab = wv_emb.astype(compute_dtype)
        Tdim = R

    kern = functools.partial(
        _rel_attn_kernel, num_head=num_head, dim_per_head=dh, kclip=kclip,
        time_step=time_step, skew=skew, unskew=unskew,
        compute_dtype=compute_dtype)

    out_shape = [jax.ShapeDtypeStruct((B, Lq, D), compute_dtype)]
    out_specs = [pl.BlockSpec((1, Lq, D), lambda b: (b, 0, 0))]
    if return_attn:
        out_shape.append(jax.ShapeDtypeStruct((B, num_head, Lq, Lk),
                                              compute_dtype))
        out_specs.append(pl.BlockSpec((1, num_head, Lq, Lk),
                                      lambda b: (b, 0, 0, 0)))

    abytes = jnp.dtype(compute_dtype).itemsize
    est = (2 * ((Lq + 2 * Lk) * D * abytes + Lq * D * abytes
                + (num_head * Lq * Lk * abytes if return_attn else 0))
           + 2 * 2 * Tdim * dh * abytes + 4 * Lk
           + 6 * Lq * (Lk + Tdim) * 4)

    outs = pl.pallas_call(
        kern,
        out_shape=tuple(out_shape),
        grid=(B,),
        in_specs=[
            pl.BlockSpec((1, Lq, D), lambda b: (b, 0, 0)),
            pl.BlockSpec((1, Lk, D), lambda b: (b, 0, 0)),
            pl.BlockSpec((1, Lk, D), lambda b: (b, 0, 0)),
            pl.BlockSpec((Tdim, dh), lambda b: (0, 0)),
            pl.BlockSpec((Tdim, dh), lambda b: (0, 0)),
            pl.BlockSpec((1, 1, Lk), lambda b: (b, 0, 0)),
        ],
        out_specs=tuple(out_specs),
        compiler_params=_mosaic_params(("parallel",), est),
    )(q, k, v, wk_tab, wv_tab, kv_mask_b)

    if return_attn:
        return outs[0], outs[1]
    x = outs[0] if isinstance(outs, (tuple, list)) else outs
    return x, None


# ----------------------------------------------------------------------------
# Module wrapper
# ----------------------------------------------------------------------------
def init_params(key, num_head, model_dim, kclip):
    dh = model_dim // num_head
    ks = jax.random.split(key, 10)

    def lin(kw, kb, din, dout):
        w = jax.random.normal(kw, (din, dout), jnp.float32) * 0.1
        b = jax.random.normal(kb, (1, dout), jnp.float32) * 0.1
        return w, b

    Wq, bq = lin(ks[0], ks[1], model_dim, model_dim)
    Wk, bk = lin(ks[2], ks[3], model_dim, model_dim)
    Wv, bv = lin(ks[4], ks[5], model_dim, model_dim)
    Wo, bo = lin(ks[6], ks[7], model_dim, model_dim)
    wk_emb = jax.random.normal(ks[8], (2 * kclip + 1, dh), jnp.float32) * 0.1
    wv_emb = jax.random.normal(ks[9], (2 * kclip + 1, dh), jnp.float32) * 0.1
    return dict(Wq=Wq, bq=bq, Wk=Wk, bk=bk, Wv=Wv, bv=bv, Wo=Wo, bo=bo,
                wk_emb=wk_emb, wv_emb=wv_emb)


def prepare_params(params, compute_dtype):
    """Hoists the Wq|Wk|Wv concat and the resident-weight casts out of the
    per-call path (weights stay VMEM-resident across the whole grid)."""
    return dict(
        wqkv=jnp.concatenate([params['Wq'], params['Wk'], params['Wv']],
                             axis=1).astype(compute_dtype),
        bqkv=jnp.concatenate([params['bq'], params['bk'], params['bv']],
                             axis=1).astype(jnp.float32),
        Wq=params['Wq'].astype(compute_dtype), bq=params['bq'].astype(jnp.float32),
        Wk=params['Wk'].astype(compute_dtype), bk=params['bk'].astype(jnp.float32),
        Wv=params['Wv'].astype(compute_dtype), bv=params['bv'].astype(jnp.float32),
        Wo=params['Wo'].astype(compute_dtype), bo=params['bo'].astype(jnp.float32),
        wk_emb=params['wk_emb'].astype(jnp.float32),
        wv_emb=params['wv_emb'].astype(jnp.float32))


def rel_mha_forward(prepared, query, key, value, q_mask, kv_mask, *, num_head,
                    kclip, time_step=0, compute_dtype=jnp.bfloat16,
                    return_attn=True):
    B, Lq, D = query.shape
    Lk = key.shape[1]

    q_mask2d = q_mask.astype(jnp.float32).reshape(B * Lq, 1)
    kv_mask2d = kv_mask.astype(jnp.float32).reshape(B * Lk, 1)

    # NOTE: the fast path is gated on Python object identity; equal-but-distinct
    # arrays fall back to three separate projections (perf cliff, not a bug).
    if (query is key) and (key is value) and (Lq == Lk):
        q2, k2, v2 = fused_qkv_proj(
            query.reshape(B * Lq, D), prepared['wqkv'], prepared['bqkv'],
            q_mask2d, kv_mask2d, d_model=D, compute_dtype=compute_dtype)
    else:
        q2 = masked_linear(query.reshape(B * Lq, D), prepared['Wq'],
                           prepared['bq'], q_mask2d,
                           compute_dtype=compute_dtype, out_dtype=compute_dtype)
        k2 = masked_linear(key.reshape(B * Lk, D), prepared['Wk'],
                           prepared['bk'], kv_mask2d,
                           compute_dtype=compute_dtype, out_dtype=compute_dtype)
        v2 = masked_linear(value.reshape(B * Lk, D), prepared['Wv'],
                           prepared['bv'], kv_mask2d,
                           compute_dtype=compute_dtype, out_dtype=compute_dtype)

    q3 = q2.reshape(B, Lq, D)
    k3 = k2.reshape(B, Lk, D)
    v3 = v2.reshape(B, Lk, D)

    kv_mask_b = kv_mask.astype(jnp.float32).reshape(B, 1, Lk)
    x, attn = rel_attention(q3, k3, v3, prepared['wk_emb'], prepared['wv_emb'],
                            kv_mask_b, num_head=num_head, kclip=kclip,
                            time_step=time_step, compute_dtype=compute_dtype,
                            return_attn=return_attn)

    xo = masked_linear(x.reshape(B * Lq, D), prepared['Wo'], prepared['bo'],
                       q_mask2d, compute_dtype=compute_dtype,
                       out_dtype=jnp.float32)
    return xo.reshape(B, Lq, D), attn


# ----------------------------------------------------------------------------
# Pure-JAX reference (mirrors the torch forward) for correctness checking
# ----------------------------------------------------------------------------
def reference_forward(params, query, key, value, q_mask, kv_mask, num_head,
                      kclip, time_step=0):
    B, Lq, D = query.shape
    Lk = key.shape[1]
    dh = D // num_head

    def proj(x, W, b, m):
        y = x @ W + b
        return jnp.where(m[:, :, None], 0.0, y)

    q = proj(query, params['Wq'], params['bq'], q_mask)
    k = proj(key, params['Wk'], params['bk'], kv_mask)
    v = proj(value, params['Wv'], params['bv'], kv_mask)
    q = q.reshape(B, Lq, num_head, dh).transpose(0, 2, 1, 3)
    k = k.reshape(B, Lk, num_head, dh).transpose(0, 2, 1, 3)
    v = v.reshape(B, Lk, num_head, dh).transpose(0, 2, 1, 3)

    i = jnp.arange(Lk)[:, None]
    j = jnp.arange(Lk)[None, :]
    pos = jnp.clip(j - i, -kclip, kclip) + kclip
    pos = pos[time_step:time_step + Lq]
    ak = params['wk_emb'][pos]
    av = params['wv_emb'][pos]

    rel = jnp.einsum('bhqd,qvd->bhqv', q, ak)
    scores = (q @ jnp.swapaxes(k, -1, -2) + rel) / math.sqrt(dh)
    scores = jnp.where(kv_mask[:, None, None, :], -jnp.inf, scores)
    attn = jax.nn.softmax(scores, axis=-1)
    rel2 = jnp.einsum('bhqv,qvd->bhqd', attn, av)
    x = attn @ v + rel2
    x = x.transpose(0, 2, 1, 3).reshape(B, Lq, D)
    x = x @ params['Wo'] + params['bo']
    x = jnp.where(q_mask[:, :, None], 0.0, x)
    return x, attn


if __name__ == "__main__":
    B, L, D, H, KCLIP = 2, 8, 32, 4, 4      # model_dim=32, num_head=4, k=4

    root = jax.random.PRNGKey(0)
    kp, kq = jax.random.split(root, 2)
    params = init_params(kp, H, D, KCLIP)

    query = jax.random.normal(kq, (B, L, D), jnp.float32)
    # True == masked (matches the torch bool masked_fill masks)
    q_mask = jnp.zeros((B, L), jnp.bool_).at[1, -2:].set(True)
    kv_mask = q_mask

    x_gold, attn_gold = reference_forward(params, query, query, query,
                                          q_mask, kv_mask, num_head=H,
                                          kclip=KCLIP)

    # f32 compute path: tight structural check of the Pallas kernels
    # (including the roll-based skew path, if available on this target).
    prep32 = prepare_params(params, jnp.float32)
    x32, attn32 = rel_mha_forward(prep32, query, query, query, q_mask, kv_mask,
                                  num_head=H, kclip=KCLIP,
                                  compute_dtype=jnp.float32)
    jax.block_until_ready((x32, attn32))
    assert jnp.allclose(x32, x_gold, atol=2e-3, rtol=2e-3), "f32 output mismatch"
    assert jnp.allclose(attn32, attn_gold, atol=2e-3, rtol=2e-3), "f32 attn mismatch"

    # bf16 compute path (perf default): bf16 MXU inputs / weights / outputs,
    # f32 accumulation, EUP approx reciprocal -- looser tolerance.
    prep16 = prepare_params(params, jnp.bfloat16)
    xbf, attnbf = rel_mha_forward(prep16, query, query, query, q_mask, kv_mask,
                                  num_head=H, kclip=KCLIP,
                                  compute_dtype=jnp.bfloat16)
    jax.block_until_ready((xbf, attnbf))
    assert jnp.allclose(xbf, x_gold, atol=4e-2, rtol=4e-2), "bf16 output mismatch"
    assert jnp.allclose(attnbf.astype(jnp.float32), attn_gold,
                        atol=4e-2, rtol=4e-2), "bf16 attn mismatch"

    # Optional-attn path (drops the (B, H, Lq, Lk) HBM writeback entirely).
    xna, attn_none = rel_mha_forward(prep16, query, query, query, q_mask,
                                     kv_mask, num_head=H, kclip=KCLIP,
                                     compute_dtype=jnp.bfloat16,
                                     return_attn=False)
    jax.block_until_ready(xna)
    assert attn_none is None
    assert jnp.allclose(xna, x_gold, atol=4e-2, rtol=4e-2), "no-attn output mismatch"

    print("KERNEL_OK")
</pallas_src>

<mosaic_0001>
module attributes {stable_mosaic.version = 11 : i64} {
  func.func @_fused_qkv_kernel(%arg0: i32, %arg1: memref<16x32xf32, #tpu.memory_space<vmem>>, %arg2: memref<32x96xf32, #tpu.memory_space<vmem>>, %arg3: memref<1x96xf32, #tpu.memory_space<vmem>>, %arg4: memref<16x1xf32, #tpu.memory_space<vmem>>, %arg5: memref<16x1xf32, #tpu.memory_space<vmem>>, %arg6: memref<16x32xf32, #tpu.memory_space<vmem>>, %arg7: memref<16x32xf32, #tpu.memory_space<vmem>>, %arg8: memref<16x32xf32, #tpu.memory_space<vmem>>) attributes {dimension_semantics = [#tpu.dimension_semantics<parallel>], iteration_bounds = array<i64: 1>, scalar_prefetch = 0 : i64, scratch_operands = 0 : i64, tpu.core_type = #tpu.core_type<tc>, window_params = [{transform_indices = @transform_0, window_bounds = array<i64: 16, 32>}, {pipeline_mode = #tpu.pipeline_mode<synchronous>, transform_indices = @transform_1, window_bounds = array<i64: 32, 96>}, {pipeline_mode = #tpu.pipeline_mode<synchronous>, transform_indices = @transform_2, window_bounds = array<i64: 1, 96>}, {transform_indices = @transform_3, window_bounds = array<i64: 16, 1>}, {transform_indices = @transform_4, window_bounds = array<i64: 16, 1>}, {transform_indices = @transform_5, window_bounds = array<i64: 16, 32>}, {transform_indices = @transform_6, window_bounds = array<i64: 16, 32>}, {transform_indices = @transform_7, window_bounds = array<i64: 16, 32>}]} {
    %c0 = arith.constant 0 : index
    %c0_0 = arith.constant 0 : index
    %0 = vector.load %arg1[%c0, %c0_0] : memref<16x32xf32, #tpu.memory_space<vmem>>, vector<16x32xf32>
    %c0_1 = arith.constant 0 : index
    %c0_2 = arith.constant 0 : index
    %1 = vector.load %arg2[%c0_1, %c0_2] : memref<32x96xf32, #tpu.memory_space<vmem>>, vector<32x96xf32>
    %cst = arith.constant dense<0.000000e+00> : vector<16x96xf32>
    %2 = tpu.matmul %0, %1, %cst {dimension_numbers = #tpu.dot_dimension_numbers<[1], [0], [0], [1], [0, 0, 1, 1], [], []>} : vector<16x32xf32>, vector<32x96xf32>, vector<16x96xf32> -> vector<16x96xf32>
    %c0_3 = arith.constant 0 : index
    %c0_4 = arith.constant 0 : index
    %3 = vector.load %arg3[%c0_3, %c0_4] : memref<1x96xf32, #tpu.memory_space<vmem>>, vector<1x96xf32>
    %4 = vector.broadcast %3 : vector<1x96xf32> to vector<16x96xf32>
    %5 = arith.addf %2, %4 : vector<16x96xf32>
    %c0_5 = arith.constant 0 : index
    %c0_6 = arith.constant 0 : index
    %6 = vector.load %arg4[%c0_5, %c0_6] : memref<16x1xf32, #tpu.memory_space<vmem>>, vector<16x1xf32>
    %cst_7 = arith.constant 5.000000e-01 : f32
    %7 = vector.broadcast %cst_7 : f32 to vector<16x1xf32>
    %8 = arith.cmpf ogt, %6, %7 : vector<16x1xf32>
    %c0_8 = arith.constant 0 : index
    %c0_9 = arith.constant 0 : index
    %9 = vector.load %arg5[%c0_8, %c0_9] : memref<16x1xf32, #tpu.memory_space<vmem>>, vector<16x1xf32>
    %cst_10 = arith.constant 5.000000e-01 : f32
    %10 = vector.broadcast %cst_10 : f32 to vector<16x1xf32>
    %11 = arith.cmpf ogt, %9, %10 : vector<16x1xf32>
    %12 = vector.extract_strided_slice %5 {offsets = [0, 0], sizes = [16, 32], strides = [1, 1]} : vector<16x96xf32> to vector<16x32xf32>
    %cst_11 = arith.constant 0.000000e+00 : f32
    %13 = vector.shape_cast %8 : vector<16x1xi1> to vector<16x1xi1>
    %14 = vector.broadcast %13 : vector<16x1xi1> to vector<16x32xi1>
    %15 = vector.broadcast %cst_11 : f32 to vector<16x32xf32>
    %16 = arith.select %14, %15, %12 : vector<16x32xi1>, vector<16x32xf32>
    %c0_12 = arith.constant 0 : index
    %c0_13 = arith.constant 0 : index
    %17 = vector.load %arg6[%c0_12, %c0_13] : memref<16x32xf32, #tpu.memory_space<vmem>>, vector<16x32xf32>
    tpu.vector_store %arg6[%c0_12, %c0_13], %16 {strides = array<i32>} : memref<16x32xf32, #tpu.memory_space<vmem>>, vector<16x32xf32>,
    %18 = vector.extract_strided_slice %5 {offsets = [0, 32], sizes = [16, 32], strides = [1, 1]} : vector<16x96xf32> to vector<16x32xf32>
    %cst_14 = arith.constant 0.000000e+00 : f32
    %19 = vector.shape_cast %11 : vector<16x1xi1> to vector<16x1xi1>
    %20 = vector.broadcast %19 : vector<16x1xi1> to vector<16x32xi1>
    %21 = vector.broadcast %cst_14 : f32 to vector<16x32xf32>
    %22 = arith.select %20, %21, %18 : vector<16x32xi1>, vector<16x32xf32>
    %c0_15 = arith.constant 0 : index
    %c0_16 = arith.constant 0 : index
    %23 = vector.load %arg7[%c0_15, %c0_16] : memref<16x32xf32, #tpu.memory_space<vmem>>, vector<16x32xf32>
    tpu.vector_store %arg7[%c0_15, %c0_16], %22 {strides = array<i32>} : memref<16x32xf32, #tpu.memory_space<vmem>>, vector<16x32xf32>,
    %24 = vector.extract_strided_slice %5 {offsets = [0, 64], sizes = [16, 32], strides = [1, 1]} : vector<16x96xf32> to vector<16x32xf32>
    %cst_17 = arith.constant 0.000000e+00 : f32
    %25 = vector.shape_cast %11 : vector<16x1xi1> to vector<16x1xi1>
    %26 = vector.broadcast %25 : vector<16x1xi1> to vector<16x32xi1>
    %27 = vector.broadcast %cst_17 : f32 to vector<16x32xf32>
    %28 = arith.select %26, %27, %24 : vector<16x32xi1>, vector<16x32xf32>
    %c0_18 = arith.constant 0 : index
    %c0_19 = arith.constant 0 : index
    %29 = vector.load %arg8[%c0_18, %c0_19] : memref<16x32xf32, #tpu.memory_space<vmem>>, vector<16x32xf32>
    tpu.vector_store %arg8[%c0_18, %c0_19], %28 {strides = array<i32>} : memref<16x32xf32, #tpu.memory_space<vmem>>, vector<16x32xf32>,
    return
  }
  func.func @transform_0(%arg0: i32) -> (i32, i32) {
    %c0_i32 = arith.constant 0 : i32
    %c0_i32_0 = arith.constant 0 : i32
    return %arg0, %c0_i32 : i32, i32
  }
  func.func @transform_1(%arg0: i32) -> (i32, i32) {
    %c0_i32 = arith.constant 0 : i32
    %c0_i32_0 = arith.constant 0 : i32
    %c0_i32_1 = arith.constant 0 : i32
    return %c0_i32, %c0_i32_0 : i32, i32
  }
  func.func @transform_2(%arg0: i32) -> (i32, i32) {
    %c0_i32 = arith.constant 0 : i32
    %c0_i32_0 = arith.constant 0 : i32
    %c0_i32_1 = arith.constant 0 : i32
    return %c0_i32, %c0_i32_0 : i32, i32
  }
  func.func @transform_3(%arg0: i32) -> (i32, i32) {
    %c0_i32 = arith.constant 0 : i32
    %c0_i32_0 = arith.constant 0 : i32
    return %arg0, %c0_i32 : i32, i32
  }
  func.func @transform_4(%arg0: i32) -> (i32, i32) {
    %c0_i32 = arith.constant 0 : i32
    %c0_i32_0 = arith.constant 0 : i32
    return %arg0, %c0_i32 : i32, i32
  }
  func.func @transform_5(%arg0: i32) -> (i32, i32) {
    %c0_i32 = arith.constant 0 : i32
    %c0_i32_0 = arith.constant 0 : i32
    return %arg0, %c0_i32 : i32, i32
  }
  func.func @transform_6(%arg0: i32) -> (i32, i32) {
    %c0_i32 = arith.constant 0 : i32
    %c0_i32_0 = arith.constant 0 : i32
    return %arg0, %c0_i32 : i32, i32
  }
  func.func @transform_7(%arg0: i32) -> (i32, i32) {
    %c0_i32 = arith.constant 0 : i32
    %c0_i32_0 = arith.constant 0 : i32
    return %arg0, %c0_i32 : i32, i32
  }
}

</mosaic_0001>

<bundles_post_ra>
// kernel: tpu_custom_call.1
= control target key start
LH: loop header
LB: loop body
LE: loop exit
PB: predicated region body
PF: predicated region fallthrough
CT: control target
= control target key end

     0   :  { %13 = vsyncpa [#allocation3], 0  ;;  %s511_s0 = inlined_call_operand.hbm [shape: f32[16,32], index: 0, kind: input, shape index: {}]   ;;  %s512_s1 = inlined_call_operand.vmem [shape: f32[32,96], index: 1, kind: input, shape index: {}]   ;;  %s513_s2 = inlined_call_operand.vmem [shape: f32[1,96], index: 2, kind: input, shape index: {}]   ;;  %s514_s3 = inlined_call_operand.vmem [shape: f32[16,1], index: 3, kind: input, shape index: {}]   ;;  %s515_s4 = inlined_call_operand.vmem [shape: f32[16,1], index: 4, kind: input, shape index: {}]   ;;  %s516_s5 = inlined_call_operand.hbm [shape: f32[16,32], index: 5, kind: output, shape index: {0}]   ;;  %s517_s6 = inlined_call_operand.hbm [shape: f32[16,32], index: 6, kind: output, shape index: {1}]   ;;  %s518_s7 = inlined_call_operand.hbm [shape: f32[16,32], index: 7, kind: output, shape index: {2}]  }
   0x1   :  { %14 = vsyncpa [#allocation4], 0 }
   0x2   :  { %15 = vsyncpa [#allocation7], 0  ;;  %s367_s24 = smov [#allocation2]   ;;  %s273_s28 = scalar_lea.hbm %s511_s0, 256 }
   0x3   :  { %s21_s25 = sshll.u32 %s367_s24, 4  ;;  %p274_p0 = scmp.ne.s32.totalorder %s511_s0, %s273_s28  ;;  %s22_s25 = int_to_ptr.vmem [resolvable:$true] %s21_s25 }
   0x4   :  { %p277_p1 = scmp.lt.u32.totalorder %s273_s28, %s511_s0 }
   0x6   :  { %p279_p2 = pnand %p277_p1, %p274_p0 }
   0x8   :  { %282 = shalt.err (!%p279_p2)
}
   0x9   :  { %s283_s10 = scalar_lea.vmem %s22_s25, 256  ;;  %p288_p4 = scmp.lt.s32.totalorder %s22_s25, %s22_s25 }
   0xa   :  { %p284_p3 = scmp.ne.s32.totalorder %s22_s25, %s283_s10  ;;  %p289_p5 = scmp.lt.s32.totalorder %s283_s10, %s283_s10 }
   0xc   :  { %p290_p6 = por %p289_p5, %p288_p4 }
   0xe   :  { %p291_p7 = pnand %p290_p6, %p284_p3 }
  0x10   :  { %294 = shalt.err (!%p291_p7)
}
  0x11   :  { %s368_s11 = smov 128   ;;  %s369_s12 = smov 8  }
  0x12   :  { %27 = dma.hbm_to_vmem [thread:$0]  %s511_s0, 256, %s22_s25, [#allocation3], %s368_s11, %s368_s11, %s369_s12  }
  0x13   :  { %361 = dma.done.wait [#allocation3], 256  }
  0x14   :  { %362 = vsyncadd [#allocation3], 4294967040  ;;  %v370_v0 = vmov 0   ;;  %vm52_vm0 = vcmask 261120   ;;  %v41_v1 = vld [vmem:[%s512_s1] sm:$0xff]  ;;  %v42_v2 = vld [vmem:[%s512_s1 + $0x8] sm:$0xff] }
  0x15   :  { %271 = vset.pattern.permute.xlu0 %v370_v0  ;;  %272 = vset.pattern.permute.xlu1 %v370_v0  ;;  %v43_v3 = vld [vmem:[%s512_s1 + $0x10] sm:$0xff]  ;;  %v254_v4 = vpack.c.bf16 %v42_v2, %v41_v1  ;;  %v44_v5 = vld [vmem:[%s512_s1 + $0x18] sm:$0xff]  ;;  %v39_v6 = vld [vmem:[#allocation2] sm:$0xff]  ;;  %s371_s29 = smov [#allocation5]   ;;  %s372_s8 = smov 96  }
  0x16   :  { %v258_v7 = vpack.c.bf16 %v44_v5, %v43_v3  ;;  %251 = vmatprep.mubr.msk.f32.mxu0 %vm52_vm0, %v39_v6  ;;  %v138_v8 = vld [vmem:[%s515_s4] sm:$0xff]  ;;  %v139_v10 = vld [vmem:[%s515_s4 + $0x8] sm:$0xff]  ;;  %s191_s30 = sshll.u32 %s371_s29, 4  ;;  %s192_s30 = int_to_ptr.vmem [resolvable:$true] %s191_s30 }
  0x17   :  { %v134_v9 = vld [vmem:[%s514_s3] sm:$0xff]  ;;  %255 = vmatprep.subr.bf16.mxu0 %v254_v4  ;;  %vm140_vm1 = vcmp.gt.f32.partialorder %v138_v8, 0.5  ;;  %vm141_vm3 = vcmp.gt.f32.partialorder %v139_v10, 0.5  ;;  %v135_v11 = vld [vmem:[%s514_s3 + $0x8] sm:$0xff]  ;;  %p300_p9 = scmp.lt.s32.totalorder %s192_s30, %s192_s30 }
  0x18   :  { %vm136_vm2 = vcmp.gt.f32.partialorder %v134_v9, 0.5  ;;  %257 = vmatpush3.bf16.msra.mxu0 %v254_v4  ;;  %v156_v12 = vsel %vm140_vm1, 1, %v370_v0  ;;  %vm137_vm4 = vcmp.gt.f32.partialorder %v135_v11, 0.5  ;;  %v157_v14 = vsel %vm141_vm3, 1, %v370_v0  ;;  %v40_v16 = vld [vmem:[#allocation2 + $0x8] sm:$0xff] }
  0x19   :  { %v142_v13 = vsel %vm136_vm2, 1, %v370_v0  ;;  %259 = vmatprep.subr.bf16.mxu0 %v258_v7  ;;  %159 = vperm.xlu0 %271, %v156_v12   ;;  %v143_v15 = vsel %vm137_vm4, 1, %v370_v0  ;;  %v234_v20 = vld [vmem:[%s513_s2] ss:$0 sm:$0xff]  ;;  %s295_s2 = scalar_lea.vmem %s192_s30, 256 }
  0x1a   :  { %145 = vperm.xlu1 %272, %v142_v13   ;;  %p296_p8 = scmp.ne.s32.totalorder %s192_s30, %s295_s2  ;;  %p301_p10 = scmp.lt.s32.totalorder %s295_s2, %s295_s2 }
  0x1c   :  { %261 = vmatpush3.bf16.msra.mxu0 %v258_v7  ;;  %p302_p11 = por %p301_p10, %p300_p9 }
  0x1d   :  { %162 = vperm.xlu0 %271, %v157_v14  }
  0x1e   :  { %148 = vperm.xlu1 %272, %v143_v15   ;;  %p303_p12 = pnand %p302_p11, %p296_p8 }
  0x1f   :  { %252 = vmatmul.mubr.msk.f32.vlgmr.msra.gmra.mrb[0].mxu0 %vm52_vm0, %v40_v16 }
  0x98   :  { %v160_v18 = vpop.permute.xlu0 %159 }
  0x99   :  { %v146_v17 = vpop.permute.xlu1 %145  ;;  %vm164_vm8 = vcmp.eq.s32.totalorder %v160_v18, 1 }
  0x9a   :  { %vm150_vm6 = vcmp.eq.s32.totalorder %v146_v17, 1 }
  0x9c   :  { %v163_v21 = vpop.permute.xlu0 %162 }
  0x9d   :  { %v149_v19 = vpop.permute.xlu1 %148  ;;  %vm165_vm7 = vcmp.eq.s32.totalorder %v163_v21, 1 }
  0x9e   :  { %vm151_vm5 = vcmp.eq.s32.totalorder %v149_v19, 1 }
  0xf2   :  { %v253_v22 = vpop.f32.mrb[0].mxu0 }
  0xf3   :  { %v131_v23 = vadd.f32 %v253_v22, %v234_v20  ;;  %v125_v24 = vpop.f32.mrb[1].mxu0 }
  0xf4   :  { %v126_v25 = vadd.f32 %v234_v20, %v125_v24 }
  0xf5   :  { %v153_v26 = vsel %vm151_vm5, 0.0, %v131_v23  ;;  %v167_v27 = vsel %vm165_vm7, 0.0, %v131_v23 }
  0xf6   :  { %155 = vst.msk [vmem:[#allocation5 + $0x8] sm:$0xff] %vm52_vm0, %v153_v26  ;;  %v152_v28 = vsel %vm150_vm6, 0.0, %v126_v25  ;;  %172 = vrot.lane.b32.xlu1 %v167_v27, %s372_s8  ;;  %v166_v29 = vsel %vm164_vm8, 0.0, %v126_v25 }
  0xf7   :  { %154 = vst.msk [vmem:[#allocation5] sm:$0xff] %vm52_vm0, %v152_v28  ;;  %170 = vrot.lane.b32.xlu0 %v166_v29, %s372_s8 }
  0xf8   :  { %306 = shalt.err (!%p303_p12)
}
  0xf9   :  { %s307_s13 = scalar_lea.hbm %s516_s5, 256 }
  0xfa   :  { %p308_p13 = scmp.ne.s32.totalorder %s516_s5, %s307_s13  ;;  %p311_p0 = scmp.lt.u32.totalorder %s307_s13, %s516_s5 }
  0xfc   :  { %p313_p1 = pnand %p311_p0, %p308_p13 }
  0xfe   :  { %316 = shalt.err (!%p313_p1)
}
  0xff   :  { %197 = dma.vmem_to_hbm [thread:$0]  %s192_s30, 256, %s516_s5, [#allocation4], %s368_s11, %s368_s11, %s369_s12  }
 0x100   :  { %s373_s20 = smov 64   ;;  %s374_s0 = smov [#allocation6]  }
 0x101   :  { %180 = vrot.lane.b32.xlu1 %v167_v27, %s373_s20  ;;  %178 = vrot.lane.b32.xlu0 %v166_v29, %s373_s20  ;;  %s203_s21 = sshll.u32 %s374_s0, 4  ;;  %s375_s22 = smov [#allocation8]   ;;  %s204_s21 = int_to_ptr.vmem [resolvable:$true] %s203_s21 }
 0x102   :  { %s215_s23 = sshll.u32 %s375_s22, 4  ;;  %s317_s24 = scalar_lea.vmem %s204_s21, 256  ;;  %s216_s23 = int_to_ptr.vmem [resolvable:$true] %s215_s23 }
 0x103   :  { %p318_p2 = scmp.ne.s32.totalorder %s204_s21, %s317_s24  ;;  %p322_p3 = scmp.lt.s32.totalorder %s204_s21, %s204_s21 }
 0x104   :  { %p323_p4 = scmp.lt.s32.totalorder %s317_s24, %s317_s24 }
 0x106   :  { %p324_p5 = por %p323_p4, %p322_p3 }
 0x108   :  { %p325_p6 = pnand %p324_p5, %p318_p2 }
 0x168   :  { %v173_v30 = vpop.permute.xlu1 %172 }
 0x169   :  { %177 = vst.msk [vmem:[#allocation6 + $0x8] sm:$0xff] %vm52_vm0, %v173_v30  ;;  %v171_v31 = vpop.permute.xlu0 %170 }
 0x16a   :  { %176 = vst.msk [vmem:[#allocation6] sm:$0xff] %vm52_vm0, %v171_v31 }
 0x16b   :  { %328 = shalt.err (!%p325_p6)
}
 0x16c   :  { %s329_s26 = scalar_lea.hbm %s517_s6, 256 }
 0x16d   :  { %p330_p7 = scmp.ne.s32.totalorder %s517_s6, %s329_s26  ;;  %p333_p8 = scmp.lt.u32.totalorder %s329_s26, %s517_s6 }
 0x16f   :  { %p335_p9 = pnand %p333_p8, %p330_p7 }
 0x171   :  { %338 = shalt.err (!%p335_p9)
}
 0x172   :  { %209 = dma.vmem_to_hbm [thread:$0]  %s204_s21, 256, %s517_s6, [#allocation7], %s368_s11, %s368_s11, %s369_s12  }
 0x173   :  { %v181_v32 = vpop.permute.xlu1 %180  ;;  %v179_v33 = vpop.permute.xlu0 %178  ;;  %s339_s30 = scalar_lea.vmem %s216_s23, 256  ;;  %p344_p11 = scmp.lt.s32.totalorder %s216_s23, %s216_s23 }
 0x174   :  { %185 = vst.msk [vmem:[#allocation8 + $0x8] sm:$0xff] %vm52_vm0, %v181_v32  ;;  %184 = vst.msk [vmem:[#allocation8] sm:$0xff] %vm52_vm0, %v179_v33  ;;  %p340_p10 = scmp.ne.s32.totalorder %s216_s23, %s339_s30  ;;  %p345_p12 = scmp.lt.s32.totalorder %s339_s30, %s339_s30 }
 0x176   :  { %p346_p13 = por %p345_p12, %p344_p11 }
 0x178   :  { %p347_p0 = pnand %p346_p13, %p340_p10 }
 0x17a   :  { %350 = shalt.err (!%p347_p0)
}
 0x17b   :  { %s351_s9 = scalar_lea.hbm %s518_s7, 256 }
 0x17c   :  { %p352_p1 = scmp.ne.s32.totalorder %s518_s7, %s351_s9  ;;  %p355_p2 = scmp.lt.u32.totalorder %s351_s9, %s518_s7 }
 0x17e   :  { %p357_p3 = pnand %p355_p2, %p352_p1 }
 0x180   :  { %360 = shalt.err (!%p357_p3)
}
 0x181   :  { %221 = dma.vmem_to_hbm [thread:$0]  %s216_s23, 256, %s518_s7, [#allocation7], %s368_s11, %s368_s11, %s369_s12  }
 0x182   :  { %363 = dma.done.wait [#allocation4], 256  }
 0x183   :  { %364 = vsyncadd [#allocation4], 4294967040 }
 0x184   :  { %365 = dma.done.wait [#allocation7], 512  }
 0x185   :  { %366 = vsyncadd [#allocation7], 4294966784 }
 0x186   :  { %231 = vsyncpa [#allocation3], 1 }
 0x187   :  { %232 = vsyncpa [#allocation4], 1 }
 0x188   :  { %233 = vsyncpa [#allocation7], 1 }

</bundles_post_ra>
